<compile_context>
chip_gen: v6e
topology: v6e:2x2x1
jax: 0.10.0
libtpu: 0.0.40
codegen_flags: <defaults>
</compile_context>

<pallas_src>
import math

import jax
import jax.numpy as jnp
from jax.experimental import pallas as pl
from jax.experimental.pallas import tpu as pltpu


# -----------------------------------------------------------------------------
# PE table — identical to the PyTorch buffer `pe` (with a guard for odd d_model)
# -----------------------------------------------------------------------------
def make_positional_encoding(d_model: int, max_len: int = 5000,
                             dtype=jnp.float32) -> jnp.ndarray:
    position = jnp.arange(max_len, dtype=jnp.float32)[:, None]            # (L, 1)
    div_term = jnp.exp(
        jnp.arange(0, d_model, 2, dtype=jnp.float32)
        * (-math.log(10000.0) / d_model))                                 # (ceil(D/2),)
    ang = position * div_term                                             # (L, ceil(D/2))
    pe = jnp.zeros((max_len, 1, d_model), dtype=jnp.float32)
    pe = pe.at[:, 0, 0::2].set(jnp.sin(ang))
    pe = pe.at[:, 0, 1::2].set(jnp.cos(ang[:, : d_model // 2]))           # odd-D safe
    return pe.astype(dtype)


# -----------------------------------------------------------------------------
# Kernels
# -----------------------------------------------------------------------------
def _pe_add_kernel(x_ref, pe_ref, o_ref):
    # x_ref: (ts, B, D), pe_ref: (ts, 1, D) — broadcast over the batch (sublane) axis.
    o_ref[...] = x_ref[...] + pe_ref[...]


def _pe_add_kernel_batch_first(x_ref, pe_ref, o_ref):
    # x_ref: (B, ts, D), pe_ref: (ts, D) — last two block dims (ts, D) are
    # sublane/lane dense even when B and D are small.
    o_ref[...] = x_ref[...] + pe_ref[...][None, :, :]


# -----------------------------------------------------------------------------
# Tiling policy
# -----------------------------------------------------------------------------
# Conservative total-VMEM budget for the double-buffered x/pe/out blocks:
# fits v5e's 16 MiB scoped default and leaves headroom on v7x (64 MiB physical).
_VMEM_BUDGET_BYTES = 8 * 1024 * 1024


def _choose_tile_s(S: int, B: int, D: int, itemsize: int, *, multiple_of: int = 1) -> int:
    # VMEM bytes per S-row: double-buffered x block + pe block + out block.
    per_row = 2 * (B * D + D + B * D) * itemsize
    t = max(1, _VMEM_BUDGET_BYTES // per_row)
    # Keep >= 2 grid steps when seq_len allows it: enables DMA/compute
    # pipelining and lets v7x split the "parallel" axis across its 2 TCs.
    t = min(t, max(1, pl.cdiv(S, 2)), S)
    if multiple_of > 1:
        t = max(multiple_of, (t // multiple_of) * multiple_of)
    return int(t)


# -----------------------------------------------------------------------------
# Forward wrappers
# -----------------------------------------------------------------------------
def positional_encoding_forward(x: jnp.ndarray, pe: jnp.ndarray, *,
                                tile_s: int | None = None,
                                donate_x: bool = False) -> jnp.ndarray:
    """x: [seq_len, batch, d_model]; pe: [max_len, 1, d_model] -> x + pe[:seq_len].

    Same axis convention as the PyTorch module. The full pe table is passed in;
    the BlockSpec index_map only reads rows < seq_len (no pe[:S] copy in HBM).
    """
    S, B, D = x.shape
    max_len = pe.shape[0]
    if pe.shape != (max_len, 1, D):
        raise ValueError(f"pe shape {pe.shape} incompatible with d_model={D}")
    if S > max_len:
        raise ValueError(f"seq_len={S} exceeds max_len={max_len}")
    if pe.dtype != x.dtype:
        pe = pe.astype(x.dtype)  # keep the table in the model dtype to avoid this cast

    if tile_s is None:
        tile_s = _choose_tile_s(S, B, D, jnp.dtype(x.dtype).itemsize)
    grid = (pl.cdiv(S, tile_s),)

    kwargs = {}
    if donate_x:
        # Alias the output onto x (caller must not reuse x afterwards):
        # removes the extra HBM output allocation.
        kwargs["input_output_aliases"] = {0: 0}

    return pl.pallas_call(
        _pe_add_kernel,
        out_shape=jax.ShapeDtypeStruct((S, B, D), x.dtype),
        grid=grid,
        in_specs=[
            pl.BlockSpec((tile_s, B, D), lambda i: (i, 0, 0)),
            pl.BlockSpec((tile_s, 1, D), lambda i: (i, 0, 0)),
        ],
        out_specs=pl.BlockSpec((tile_s, B, D), lambda i: (i, 0, 0)),
        compiler_params=pltpu.CompilerParams(
            dimension_semantics=("parallel",)),
        **kwargs,
    )(x, pe)


def positional_encoding_forward_batch_first(x: jnp.ndarray, pe: jnp.ndarray, *,
                                            tile_s: int | None = None) -> jnp.ndarray:
    """Lane-dense variant for callers whose activations are already batch-first.

    x: [batch, seq_len, d_model]; pe: [max_len, 1, d_model] (same table).
    Block last-two dims are (tile_s, d_model): dense in sublanes/lanes even when
    batch and d_model are small. Only use when the data is batch-first already —
    inserting a transpose would cost an extra HBM pass and cancel the win.
    """
    B, S, D = x.shape
    max_len = pe.shape[0]
    if S > max_len:
        raise ValueError(f"seq_len={S} exceeds max_len={max_len}")
    pe2d = pe.reshape(max_len, D)  # metadata-only squeeze of the size-1 axis
    if pe2d.dtype != x.dtype:
        pe2d = pe2d.astype(x.dtype)

    if tile_s is None:
        tile_s = _choose_tile_s(S, B, D, jnp.dtype(x.dtype).itemsize, multiple_of=8)
    grid = (pl.cdiv(S, tile_s),)

    return pl.pallas_call(
        _pe_add_kernel_batch_first,
        out_shape=jax.ShapeDtypeStruct((B, S, D), x.dtype),
        grid=grid,
        in_specs=[
            pl.BlockSpec((B, tile_s, D), lambda i: (0, i, 0)),
            pl.BlockSpec((tile_s, D), lambda i: (i, 0)),
        ],
        out_specs=pl.BlockSpec((B, tile_s, D), lambda i: (0, i, 0)),
        compiler_params=pltpu.CompilerParams(
            dimension_semantics=("parallel",)),
    )(x, pe2d)


# TODO(synk): the rest of WM.forward (Linear embedders, nn.Transformer encoder/
# decoder, GELU MLP decoder) is outside the scope of this PositionalEncoding kernel.


if __name__ == "__main__":
    # Shapes consistent with WM: d_model = lattent_size = 32, max_len = 40,
    # small seq/batch for the smoke test.  x: [seq_len, batch, d_model].
    seq_len, batch, d_model, max_len = 8, 2, 32, 40

    key = jax.random.PRNGKey(0)
    x = jax.random.normal(key, (seq_len, batch, d_model), dtype=jnp.float32)
    pe = make_positional_encoding(d_model, max_len=max_len, dtype=jnp.float32)

    ref = x + pe[:seq_len]

    # Main path — module's [seq_len, batch, d_model] convention.
    out = jax.block_until_ready(positional_encoding_forward(x, pe))
    assert out.shape == (seq_len, batch, d_model)
    assert out.dtype == x.dtype
    assert jnp.allclose(out, ref, atol=1e-6, rtol=1e-6), "seq-first mismatch"

    # Lane-dense batch-first path (for callers with batch-first activations).
    x_bf = jnp.transpose(x, (1, 0, 2))  # test-only transpose to build the input
    out_bf = jax.block_until_ready(positional_encoding_forward_batch_first(x_bf, pe))
    assert jnp.allclose(out_bf, jnp.transpose(ref, (1, 0, 2)),
                        atol=1e-6, rtol=1e-6), "batch-first mismatch"

    print("KERNEL_OK")
</pallas_src>

<mosaic_0001>
module attributes {stable_mosaic.version = 11 : i64} {
  func.func @_pe_add_kernel(%arg0: i32, %arg1: memref<4x2x32xf32, #tpu.memory_space<vmem>>, %arg2: memref<4x1x32xf32, #tpu.memory_space<vmem>>, %arg3: memref<4x2x32xf32, #tpu.memory_space<vmem>>) attributes {dimension_semantics = [#tpu.dimension_semantics<parallel>], iteration_bounds = array<i64: 2>, scalar_prefetch = 0 : i64, scratch_operands = 0 : i64, tpu.core_type = #tpu.core_type<tc>, window_params = [{transform_indices = @transform_0, window_bounds = array<i64: 4, 2, 32>}, {transform_indices = @transform_1, window_bounds = array<i64: 4, 1, 32>}, {transform_indices = @transform_2, window_bounds = array<i64: 4, 2, 32>}]} {
    %c0 = arith.constant 0 : index
    %c0_0 = arith.constant 0 : index
    %c0_1 = arith.constant 0 : index
    %0 = vector.load %arg1[%c0, %c0_0, %c0_1] : memref<4x2x32xf32, #tpu.memory_space<vmem>>, vector<4x2x32xf32>
    %c0_2 = arith.constant 0 : index
    %c0_3 = arith.constant 0 : index
    %c0_4 = arith.constant 0 : index
    %1 = vector.load %arg2[%c0_2, %c0_3, %c0_4] : memref<4x1x32xf32, #tpu.memory_space<vmem>>, vector<4x1x32xf32>
    %2 = vector.broadcast %1 : vector<4x1x32xf32> to vector<4x2x32xf32>
    %3 = arith.addf %0, %2 : vector<4x2x32xf32>
    %c0_5 = arith.constant 0 : index
    %c0_6 = arith.constant 0 : index
    %c0_7 = arith.constant 0 : index
    %4 = vector.load %arg3[%c0_5, %c0_6, %c0_7] : memref<4x2x32xf32, #tpu.memory_space<vmem>>, vector<4x2x32xf32>
    tpu.vector_store %arg3[%c0_5, %c0_6, %c0_7], %3 {strides = array<i32>} : memref<4x2x32xf32, #tpu.memory_space<vmem>>, vector<4x2x32xf32>,
    return
  }
  func.func @transform_0(%arg0: i32) -> (i32, i32, i32) {
    %c0_i32 = arith.constant 0 : i32
    %c0_i32_0 = arith.constant 0 : i32
    %c0_i32_1 = arith.constant 0 : i32
    return %arg0, %c0_i32, %c0_i32_0 : i32, i32, i32
  }
  func.func @transform_1(%arg0: i32) -> (i32, i32, i32) {
    %c0_i32 = arith.constant 0 : i32
    %c0_i32_0 = arith.constant 0 : i32
    %c0_i32_1 = arith.constant 0 : i32
    return %arg0, %c0_i32, %c0_i32_0 : i32, i32, i32
  }
  func.func @transform_2(%arg0: i32) -> (i32, i32, i32) {
    %c0_i32 = arith.constant 0 : i32
    %c0_i32_0 = arith.constant 0 : i32
    %c0_i32_1 = arith.constant 0 : i32
    return %arg0, %c0_i32, %c0_i32_0 : i32, i32, i32
  }
}

</mosaic_0001>

<bundles_post_ra>
// kernel: tpu_custom_call.1
= control target key start
LH: loop header
LB: loop body
LE: loop exit
PB: predicated region body
PF: predicated region fallthrough
CT: control target
= control target key end

     0   :  { %7 = vsyncpa [#allocation3], 0  ;;  %s541_s0 = inlined_call_operand.vmem [shape: f32[8,2,32], index: 0, kind: input, shape index: {}]   ;;  %s542_s1 = inlined_call_operand.vmem [shape: f32[40,1,32], index: 1, kind: input, shape index: {}]   ;;  %s543_s2 = inlined_call_operand.hbm [shape: f32[8,2,32], index: 2, kind: output, shape index: {}]  }
   0x1   :  { %9 = vsyncpa [#allocation3 + $0x1], 0  ;;  %s429_s9 = smov 0   ;;  %s431_s10 = smov 0  }
   0x2   :  { %s433_s11 = smov 0   ;;  %s435_s12 = smov 0  }
   0x3 LB: > { %s450_s13 = sadd.s32 4294967295, %s409_s12   ;;  %s290_s14 = sadd.s32 4294967294, %s409_s12   ;;  %s409_s12 = sphi %s435_s12, %s549_s12   ;;  %s405_s11 = sphi %s433_s11, %s548_s11   ;;  %s401_s10 = sphi %s431_s10, %s547_s10   ;;  %s397_s9 = sphi %s429_s9, %s546_s9  }
   0x4   : > { %s454_s15 = sadd.s32 1, %s409_s12   ;;  %s74_s16 = sadd.s32 1, %s405_s11 }
   0x5   : > { %s71_s17 = ssub.s32 %s409_s12, %s454_s15  ;;  %p84_p0 = scmp.ne.s32.totalorder %s405_s11, %s401_s10 }
   0x6   : > { %p72_p1 = scmp.eq.s32.totalorder %s71_s17, 0  ;;  %p85_p2 = scmp.eq.s32.totalorder %s450_s13, 1 }
   0x7   : > { %p90_p3 = scmp.ne.s32.totalorder %s401_s10, %s397_s9  ;;  %p91_p4 = scmp.eq.s32.totalorder %s290_s14, 1 }
   0x8   : > { %s465_s18 = scalar_select %p72_p1, %s405_s11, %s74_s16  }
   0x9   : > { %p467_p5 = por %p85_p2, %p84_p0  ;;  %p471_p6 = por %p91_p4, %p90_p3 }
   0xa   : > { %p293_p7 = scmp.ge.s32.totalorder %s409_s12, 1  ;;  %p126_p8 = scmp.lt.s32.totalorder %s409_s12, 3 }
   0xc   : > { %p127_p9 = pnand %p293_p7, %p126_p8 }
   0xd   : > { %s149_s21 = sand.u32 (!%p127_p9), 1, %s401_s10   ;;  %s295_s22 = sshll.u32 (!%p127_p9), %s450_s13, 2 }
   0xe   : > { %130 = sbr.rel (%p127_p9) target bundleno = 46 (0x2e), region = 28  ;;  %s294_s23 = sshll.u32 (!%p127_p9), %s149_s21, 3 }
   0xf   : > { %p153_p10 = scmp.lt.s32.totalorder (!%p127_p9), %s295_s22, 7  ;;  %p159_p11 = scmp.lt.s32.totalorder (!%p127_p9), %s295_s22, 39 }
  0x10   : > { %s151_s4 = scalar_lea.vmem (!%p127_p9), [#allocation2], %s294_s23  ;;  %s307_s6 = sshll.u32 (!%p127_p9), %s450_s13, 7 }
  0x11   : > { %s219_s5 = sshll.u32 (!%p127_p9), %s151_s4, 4  ;;  %s493_s14 = scalar_lea.hbm (!%p127_p9), %s543_s2, %s307_s6  ;;  %s488_s5 = int_to_ptr.vmem [resolvable:$true] %s219_s5 }
  0x12   : > { %s501_s13 = scalar_lea.sflag (!%p127_p9), [#allocation3], %s149_s21  ;;  %s349_s16 = scalar_lea.vmem (!%p127_p9), %s488_s5, 128 }
  0x13   : > { %s154_s24 = scalar_select %p153_p10, %s295_s22, 7  ;;  %vm200_vm0 = vcmask 254976  }
  0x14   : > { %s551_s22 = smov (!%p159_p11, %s295_s22), 39  ;;  %p350_p12 = scmp.ne.s32.totalorder %s488_s5, %s349_s16 }
  0x15   : > { %s296_s25 = sshll.u32 %s154_s24, 1  ;;  %s161_s3 = scalar_lea.vmem %s542_s1, %s551_s22 }
  0x16   : > { %s156_s28 = scalar_lea.vmem %s541_s0, %s296_s25  ;;  %v298_v1 = vld [vmem:[%s161_s3] ss:$0 sm:$0xff]  ;;  %v299_v4 = vld [vmem:[%s161_s3 + $0x1] ss:$0 sm:$0xff]  ;;  %v300_v7 = vld [vmem:[%s161_s3 + $0x2] ss:$0 sm:$0xff]  ;;  %p351_p13 = pnand %p350_p12, %p467_p5 }
  0x17   : > { %v164_v0 = vld [vmem:[%s156_s28] sm:$0x3]  ;;  %v165_v3 = vld [vmem:[%s156_s28 + $0x2] sm:$0x3]  ;;  %v166_v5 = vld [vmem:[%s156_s28 + $0x4] sm:$0x3] }
  0x18   : > { %v196_v2 = vadd.f32 %v298_v1, %v164_v0  ;;  %v197_v6 = vadd.f32 %v299_v4, %v165_v3  ;;  %v167_v8 = vld [vmem:[%s156_s28 + $0x6] sm:$0x3]  ;;  %v301_v9 = vld [vmem:[%s161_s3 + $0x3] ss:$0 sm:$0xff]  ;;  %v198_v10 = vadd.f32 %v300_v7, %v166_v5  ;;  %p352_p0 = pneg %p351_p13  ;;  %s411_s17 = smov [#allocation2]  }
  0x19   : > { %v199_v11 = vadd.f32 %v301_v9, %v167_v8  ;;  %s353_s22 = sshll.u32 %s411_s17, 4  ;;  %s354_s22 = int_to_ptr.vmem [resolvable:$false] %s353_s22 }
  0x1a   : > { %201 = vst.msk [vmem:[%s151_s4] sm:$0x3] %vm200_vm0, %v196_v2  ;;  %202 = vst.msk [vmem:[%s151_s4 + $0x2] sm:$0x3] %vm200_vm0, %v197_v6  ;;  %s355_s23 = scalar_lea.vmem %s354_s22, 256  ;;  %p356_p1 = scmp.lt.s32.totalorder %s488_s5, %s354_s22 }
  0x1b   : > { %203 = vst.msk [vmem:[%s151_s4 + $0x4] sm:$0x3] %vm200_vm0, %v198_v10  ;;  %204 = vst.msk [vmem:[%s151_s4 + $0x6] sm:$0x3] %vm200_vm0, %v199_v11  ;;  %p357_p2 = scmp.lt.s32.totalorder %s355_s23, %s349_s16 }
  0x1d   : > { %p358_p3 = por %p357_p2, %p356_p1 }
  0x1f   : > { %p359_p4 = pnand %p358_p3, %p352_p0 }
  0x21   : > { %362 = shalt.err (!%p359_p4)
}
  0x22   : > { %s363_s21 = scalar_lea.hbm %s493_s14, 128  ;;  %s367_s26 = scalar_lea.hbm %s543_s2, 256 }
  0x23   : > { %p364_p7 = scmp.ne.s32.totalorder %s493_s14, %s363_s21  ;;  %p368_p10 = scmp.lt.s32.totalorder %s493_s14, %s543_s2 }
  0x24   : > { %p369_p11 = scmp.lt.s32.totalorder %s367_s26, %s363_s21 }
  0x25   : > { %p365_p8 = pnand %p364_p7, %p467_p5 }
  0x26   : > { %p370_p12 = por %p369_p11, %p368_p10 }
  0x27   : > { %p366_p9 = pneg %p365_p8 }
  0x29   : > { %p371_p13 = pnand %p370_p12, %p366_p9 }
  0x2b   : > { %374 = shalt.err (!%p371_p13)
}
  0x2c   : > { %s412_s29 = smov 32   ;;  %s413_s30 = smov 2  }
  0x2d   : > { %308 = dma.vmem_to_hbm [thread:$0]  (%p467_p5), %s488_s5, 128, %s493_s14, %s501_s13, %s412_s29, %s412_s29, %s413_s30  }
  0x2e PF: > { %p314_p0 = scmp.ge.s32.totalorder %s409_s12, 2  ;;  %s234_s3 = sand.u32 1, %s397_s9  }
  0x2f   : > { %s235_s4 = scalar_lea.sflag [#allocation3], %s234_s3 }
  0x30   : > { %p311_p1 = pnand %p314_p0, %p471_p6 }
  0x32   : > { %p312_p2 = pneg %p311_p1 }
  0x34   : > { %392 = dma.done.wait (%p312_p2), %s235_s4, 128  }
  0x35   : > { %394 = vsyncadd (%p312_p2), %s235_s4, 4294967168  ;;  %p12_p3 = scmp.ge.s32.totalorder %s454_s15, 4   ;;  %s546_s9 = smov %s401_s10 }
  0x36   : > { %s547_s10 = smov %s405_s11  ;;  %s548_s11 = smov %s465_s18 }
  0x37   : > { %s549_s12 = smov %s454_s15  ;;  %14 = sbr.rel (!%p12_p3) target bundleno = 3 (0x3), region = 66 }
  0x3c   :  { %240 = vsyncpa [#allocation3], 1 }
  0x3d   :  { %242 = vsyncpa [#allocation3 + $0x1], 1 }

</bundles_post_ra>
